<compile_context>
chip_gen: v6e
topology: v6e:2x2x1
jax: 0.10.0
libtpu: 0.0.40
codegen_flags: <defaults>
</compile_context>

<pallas_src>
import functools

import jax
import jax.numpy as jnp
from jax import lax
from jax.experimental import pallas as pl
from jax.experimental.pallas import tpu as pltpu

HID = 32        # model hidden size (matches the PyTorch module config)
HID_PAD = 128   # lane-padded hidden size used inside all TPU kernels


# ----------------------------------------------------------------------------
# helpers
# ----------------------------------------------------------------------------
def _full_spec(shape):
    nd = len(shape)
    return pl.BlockSpec(shape, lambda *_: (0,) * nd)


def _pad_axis(x, axis, new_size):
    pad = [(0, 0)] * x.ndim
    pad[axis] = (0, new_size - x.shape[axis])
    return jnp.pad(x, pad)


# ----------------------------------------------------------------------------
# Kernel 1: hoisted input-to-hidden projection   gx_all = x @ Wx + bx
#           one big MXU matmul over all timesteps (N = T*B rows)
# ----------------------------------------------------------------------------
def _input_proj_kernel(x_ref, w_ref, b_ref, o_ref):
    x = x_ref[...].astype(w_ref.dtype)                       # bf16 MXU operand
    o_ref[...] = (jnp.dot(x, w_ref[...], preferred_element_type=jnp.float32)
                  + b_ref[...])


def input_proj(x, w, b):
    n = x.shape[0]
    g3 = w.shape[1]
    return pl.pallas_call(
        _input_proj_kernel,
        out_shape=jax.ShapeDtypeStruct((n, g3), jnp.float32),
        in_specs=[_full_spec(x.shape), _full_spec(w.shape), _full_spec(b.shape)],
        out_specs=_full_spec((n, g3)),
    )(x, w, b)


# ----------------------------------------------------------------------------
# Kernel 2: fused GRU recurrence — one pallas_call, grid over T.
#   h is carried in a persistent VMEM scratch; Wh/bh/h0 use constant index_maps
#   (DMA'd once, VMEM resident).  Only gh = h @ Wh is computed per step.
#   Gate layout is (3, HID_PAD) flattened, so each gate slice is 128-lane aligned.
# ----------------------------------------------------------------------------
def _gru_seq_kernel(gx_ref, h0_ref, wh_ref, bh_ref, out_ref, hlast_ref, h_scr):
    hp = h0_ref.shape[1]
    t = pl.program_id(0)

    @pl.when(t == 0)
    def _():
        h_scr[...] = h0_ref[...]

    h = h_scr[...]                                           # (B, Hp) f32
    gh = (jnp.dot(h.astype(wh_ref.dtype), wh_ref[...],       # bf16 MXU, f32 acc
                  preferred_element_type=jnp.float32) + bh_ref[...])
    gx = gx_ref[0]                                           # (B, 3Hp) f32

    r = jax.nn.sigmoid(gx[:, 0:hp] + gh[:, 0:hp])
    z = jax.nn.sigmoid(gx[:, hp:2 * hp] + gh[:, hp:2 * hp])
    n = jnp.tanh(gx[:, 2 * hp:3 * hp] + r * gh[:, 2 * hp:3 * hp])
    h_new = (1.0 - z) * n + z * h

    h_scr[...] = h_new
    out_ref[0] = h_new
    hlast_ref[...] = h_new


def gru_run(emb_seq, h0, wx, wh, bx, bh):
    # emb_seq: (T, B, E) f32, h0: (B, Hp) f32
    # wx: (E, 3Hp) bf16, wh: (Hp, 3Hp) bf16, bx/bh: (1, 3Hp) f32
    t, b, e = emb_seq.shape
    hp = h0.shape[1]
    g3 = wh.shape[1]

    # one large MXU matmul for all timesteps (fills MXU rows)
    gx_all = input_proj(emb_seq.reshape(t * b, e), wx, bx).reshape(t, b, g3)

    # NOTE: only the streamed gx block is pipelined; weight blocks have constant
    # index_maps and are fetched once (do not multi-buffer them).
    outs, h_last = pl.pallas_call(
        _gru_seq_kernel,
        grid=(t,),
        out_shape=(jax.ShapeDtypeStruct((t, b, hp), jnp.float32),
                   jax.ShapeDtypeStruct((b, hp), jnp.float32)),
        in_specs=[pl.BlockSpec((1, b, g3), lambda i: (i, 0, 0)),   # streamed gx_t
                  pl.BlockSpec((b, hp), lambda i: (0, 0)),         # h0 (resident)
                  pl.BlockSpec((hp, g3), lambda i: (0, 0)),        # Wh (resident)
                  pl.BlockSpec((1, g3), lambda i: (0, 0))],        # bh (resident)
        out_specs=(pl.BlockSpec((1, b, hp), lambda i: (i, 0, 0)),
                   pl.BlockSpec((b, hp), lambda i: (0, 0))),       # resident h_last
        scratch_shapes=[pltpu.VMEM((b, hp), jnp.float32)],          # carried hidden
        compiler_params=pltpu.CompilerParams(
            dimension_semantics=("arbitrary",)),
    )(gx_all, h0, wh, bh)
    return outs, h_last


# ----------------------------------------------------------------------------
# Kernel 3: global (dot) attention — single full-block kernel, time-major I/O.
#   scores = q @ ctx^T ; align = softmax(scores) ; c = align @ ctx
#   out = tanh(c @ Wc + q @ Wq + b)
# ----------------------------------------------------------------------------
def _global_attn_kernel(q_ref, ctx_ref, wc_ref, wq_ref, b_ref,
                        out_ref, align_ref, *, batch):
    wc = wc_ref[...]                       # (Hp, Hp) bf16
    wq = wq_ref[...]                       # (Hp, Hp) bf16
    bias = b_ref[...]                      # (1, Hp)  f32
    outs, aligns = [], []
    for bi in range(batch):                # B is small & static -> unrolled
        q = q_ref[:, bi, :]                # (T, Hp) f32  (time-major input)
        ctx = ctx_ref[:, bi, :]            # (S, Hp) f32
        q_bf = q.astype(jnp.bfloat16)
        ctx_bf = ctx.astype(jnp.bfloat16)

        scores = lax.dot_general(          # (T, S), f32 accumulation
            q_bf, ctx_bf,
            dimension_numbers=(((1,), (1,)), ((), ())),
            preferred_element_type=jnp.float32)
        scores = scores - jnp.max(scores, axis=-1, keepdims=True)
        e = jnp.exp(scores)
        inv = pl.reciprocal(jnp.sum(e, axis=-1, keepdims=True), approx=True)
        align = e * inv                    # (T, S)

        c = jnp.dot(align.astype(jnp.bfloat16), ctx_bf,
                    preferred_element_type=jnp.float32)          # (T, Hp)
        out = jnp.tanh(
            jnp.dot(c.astype(jnp.bfloat16), wc, preferred_element_type=jnp.float32)
            + jnp.dot(q_bf, wq, preferred_element_type=jnp.float32)
            + bias)
        outs.append(out)
        aligns.append(align)

    out_ref[...] = jnp.stack(outs, axis=1)       # (T, B, Hp) lane-dense store
    align_ref[...] = jnp.stack(aligns, axis=1)   # (T, B, S)


def global_attention(rnn_out_tm, context_tm, wc, wq, b_attn):
    # rnn_out_tm: (T, B, Hp), context_tm: (S, B, Hp) — both time-major, no transposes.
    # TODO(synk): for large T/S, tile over (T, S) with an online-softmax accumulator
    #             (and grid over T-blocks for v7x's 2 TensorCores / 64 MiB VMEM).
    t, b, hp = rnn_out_tm.shape
    s = context_tm.shape[0]
    kernel = functools.partial(_global_attn_kernel, batch=b)
    out, align = pl.pallas_call(
        kernel,
        out_shape=(jax.ShapeDtypeStruct((t, b, hp), jnp.float32),
                   jax.ShapeDtypeStruct((t, b, s), jnp.float32)),
        in_specs=[_full_spec(rnn_out_tm.shape), _full_spec(context_tm.shape),
                  _full_spec(wc.shape), _full_spec(wq.shape),
                  _full_spec(b_attn.shape)],
        out_specs=(_full_spec((t, b, hp)), _full_spec((t, b, s))),
    )(rnn_out_tm, context_tm, wc, wq, b_attn)
    return out, align


# ----------------------------------------------------------------------------
# WALS feature handling (EncInitHidden_Target)
# ----------------------------------------------------------------------------
def flip_simulation_languages(langs, flip):
    if flip:
        langs = [langs[1], langs[0]]
    return list(langs)


def get_local_features(params, feature_values, feature_types, sim_languages):
    # wals_model == 'EncInitHidden_Target': only the TARGET language (index 1)
    target_lang = sim_languages[1]
    rows = []
    for _, feats in feature_types:
        for feat in feats:
            table = params["wals_emb"][feat]                 # (V_wals, D_wals)
            idx = feature_values[target_lang][feat]          # python int
            rows.append(table[idx][None, :])                 # (1, D_wals)
    wals_concat = jnp.concatenate(rows, axis=1)              # (1, total_wals_dim)
    # MLP_target_or_both (Linear + Tanh): a (1,F)x(F,Hp) matmul is far below
    # pallas_call launch cost -> plain XLA.  Padded cols give exact zeros.
    return jnp.tanh(wals_concat @ params["mlp_w"] + params["mlp_b"])   # (1, Hp)


# ----------------------------------------------------------------------------
# EncoderInitialization.forward
# ----------------------------------------------------------------------------
def encoder_initialization_forward(params, feature_values, feature_types,
                                   sim_languages, src, tgt, lengths,
                                   flipping=False, hidden=HID):
    """Forward pass of EncoderInitialization (wals_model='EncInitHidden_Target').

    src: (S, B) int32, tgt: (T, B) int32, lengths: (B,) int32 (unused here).
    Returns (out, attns, dec_state) like the PyTorch module.
    """
    # TODO(synk): lengths-based sequence packing/masking (pack_padded_sequence)
    #             not implemented (demo uses full-length sequences).
    sim_languages = flip_simulation_languages(sim_languages, flipping)

    wals_features = get_local_features(params, feature_values, feature_types,
                                       sim_languages)              # (1, Hp)
    dim0, dim1 = wals_features.shape
    wals_features = wals_features.reshape(1, dim0, dim1)           # (1, 1, Hp)

    tgt = tgt[:-1]                                                 # exclude last token

    # evaluate_is_tuple_hidden: encoder is a GRU -> hidden is NOT a tuple.
    batch = src.shape[1]
    hid_pad = wals_features.shape[-1]
    enc_h0 = jnp.broadcast_to(wals_features[0], (batch, hid_pad))  # (B, Hp)

    # ---- encoder (single-layer GRU, WALS-initialized hidden state) ----
    src_emb = params["src_emb"][src]                               # (S, B, E)
    context, enc_hidden = gru_run(src_emb, enc_h0,
                                  params["enc_wx"], params["enc_wh"],
                                  params["enc_bx"], params["enc_bh"])

    # ---- decoder.init_decoder_state(src, context, enc_hidden) ----
    dec_h0 = enc_hidden                                            # (B, Hp)

    # ---- decoder (StdRNNDecoder: GRU over tgt, then global attention) ----
    tgt_emb = params["tgt_emb"][tgt]                               # (T-1, B, E)
    rnn_out, dec_hidden = gru_run(tgt_emb, dec_h0,
                                  params["dec_wx"], params["dec_wh"],
                                  params["dec_bx"], params["dec_bh"])

    out_pad, align = global_attention(rnn_out, context,
                                      params["attn_wc"], params["attn_wq"],
                                      params["attn_b"])            # (T-1,B,Hp),(T-1,B,S)

    # strip internal lane padding back to the model hidden size
    out = out_pad[..., :hidden]
    dec_state = dec_hidden[:, :hidden]
    attns = {"std": align}
    return out, attns, dec_state


# ----------------------------------------------------------------------------
# deterministic parameter construction + padding/bf16 preparation
# ----------------------------------------------------------------------------
def build_params(key, src_vocab, tgt_vocab, emb_dim, hidden,
                 feature_types, wals_vocab, wals_dim):
    n_feats = sum(len(f[1]) for f in feature_types)
    total_wals = n_feats * wals_dim
    keys = iter(jax.random.split(key, 32))
    nrm = lambda shape: 0.1 * jax.random.normal(next(keys), shape, jnp.float32)

    params = {
        "src_emb": nrm((src_vocab, emb_dim)),
        "tgt_emb": nrm((tgt_vocab, emb_dim)),
        "mlp_w": nrm((total_wals, hidden)),
        "mlp_b": nrm((1, hidden)),
        "enc_wx": nrm((emb_dim, 3 * hidden)),
        "enc_wh": nrm((hidden, 3 * hidden)),
        "enc_bx": nrm((1, 3 * hidden)),
        "enc_bh": nrm((1, 3 * hidden)),
        "dec_wx": nrm((emb_dim, 3 * hidden)),
        "dec_wh": nrm((hidden, 3 * hidden)),
        "dec_bx": nrm((1, 3 * hidden)),
        "dec_bh": nrm((1, 3 * hidden)),
        "attn_wc": nrm((hidden, hidden)),
        "attn_wq": nrm((hidden, hidden)),
        "attn_b": nrm((1, hidden)),
        "wals_emb": {},
    }
    for _, feats in feature_types:
        for feat in feats:
            params["wals_emb"][feat] = nrm((wals_vocab, wals_dim))
    return params


def prepare_params(params, hid=HID, hid_pad=HID_PAD):
    """Zero-pad hidden dim to 128 lanes (per-gate aligned) and cast MXU weights to bf16.

    Zero padding is numerically exact: padded hidden dims stay 0 through the
    MLP (tanh(0)), the GRU (zero weight rows/cols + zero biases) and attention.
    """
    def pad_gates(w):                           # (..., 3H) -> (..., 3Hp)
        lead = w.shape[:-1]
        w3 = w.reshape(lead + (3, hid))
        w3 = _pad_axis(w3, w3.ndim - 1, hid_pad)
        return w3.reshape(lead + (3 * hid_pad,))

    p = dict(params)
    for pre in ("enc", "dec"):
        p[pre + "_wx"] = pad_gates(params[pre + "_wx"]).astype(jnp.bfloat16)
        p[pre + "_wh"] = _pad_axis(pad_gates(params[pre + "_wh"]),
                                   0, hid_pad).astype(jnp.bfloat16)
        p[pre + "_bx"] = pad_gates(params[pre + "_bx"])
        p[pre + "_bh"] = pad_gates(params[pre + "_bh"])
    p["mlp_w"] = _pad_axis(params["mlp_w"], 1, hid_pad)
    p["mlp_b"] = _pad_axis(params["mlp_b"], 1, hid_pad)
    p["attn_wc"] = _pad_axis(_pad_axis(params["attn_wc"], 0, hid_pad),
                             1, hid_pad).astype(jnp.bfloat16)
    p["attn_wq"] = _pad_axis(_pad_axis(params["attn_wq"], 0, hid_pad),
                             1, hid_pad).astype(jnp.bfloat16)
    p["attn_b"] = _pad_axis(params["attn_b"], 1, hid_pad)
    return p


# ----------------------------------------------------------------------------
# demo
# ----------------------------------------------------------------------------
if __name__ == "__main__":
    BATCH = 2
    SRC_LEN = 8
    TGT_LEN = 9          # tgt[:-1] -> 8 decoding steps
    EMB = 16
    SRC_VOCAB = 20
    TGT_VOCAB = 20
    WALS_VOCAB = 6
    WALS_DIM = 8

    FeatureTypes = [("Phonology", ["f_tone", "f_stress", "f_syllable"]),
                    ("WordOrder", ["f_sov", "f_adj_noun"])]
    SimulationLanguages = ["en", "pt"]
    FeatureValues = {
        "en": {"f_tone": 1, "f_stress": 2, "f_syllable": 3, "f_sov": 0, "f_adj_noun": 4},
        "pt": {"f_tone": 2, "f_stress": 0, "f_syllable": 1, "f_sov": 3, "f_adj_noun": 5},
    }

    key = jax.random.PRNGKey(0)
    kp, ks, kt = jax.random.split(key, 3)
    raw_params = build_params(kp, SRC_VOCAB, TGT_VOCAB, EMB, HID,
                              FeatureTypes, WALS_VOCAB, WALS_DIM)
    params = prepare_params(raw_params)     # pad to 128 lanes + bf16 MXU weights (once)

    src = jax.random.randint(ks, (SRC_LEN, BATCH), 0, SRC_VOCAB, jnp.int32)
    tgt = jax.random.randint(kt, (TGT_LEN, BATCH), 0, TGT_VOCAB, jnp.int32)
    lengths = jnp.full((BATCH,), SRC_LEN, jnp.int32)

    out, attns, dec_state = encoder_initialization_forward(
        params, FeatureValues, FeatureTypes, SimulationLanguages,
        src, tgt, lengths, flipping=False)

    jax.block_until_ready((out, attns["std"], dec_state))

    assert out.shape == (TGT_LEN - 1, BATCH, HID)
    assert attns["std"].shape == (TGT_LEN - 1, BATCH, SRC_LEN)
    assert dec_state.shape == (BATCH, HID)
    assert bool(jnp.all(jnp.isfinite(out)))
    assert bool(jnp.all(jnp.isfinite(dec_state)))
    # attention rows sum to ~1 (approx EUP reciprocal -> loose tolerance)
    assert jnp.allclose(jnp.sum(attns["std"], axis=-1), 1.0, atol=1e-2)

    print("KERNEL_OK")
</pallas_src>

<mosaic_0001>
module attributes {stable_mosaic.version = 11 : i64} {
  func.func @_input_proj_kernel(%arg0: memref<16x16xf32, #tpu.memory_space<vmem>>, %arg1: memref<16x384xbf16, #tpu.memory_space<vmem>>, %arg2: memref<1x384xf32, #tpu.memory_space<vmem>>, %arg3: memref<16x384xf32, #tpu.memory_space<vmem>>) attributes {dimension_semantics = [], scalar_prefetch = 0 : i64, scratch_operands = 0 : i64, tpu.core_type = #tpu.core_type<tc>} {
    %c0 = arith.constant 0 : index
    %c0_0 = arith.constant 0 : index
    %0 = vector.load %arg0[%c0, %c0_0] : memref<16x16xf32, #tpu.memory_space<vmem>>, vector<16x16xf32>
    %1 = arith.truncf %0 : vector<16x16xf32> to vector<16x16xbf16>
    %c0_1 = arith.constant 0 : index
    %c0_2 = arith.constant 0 : index
    %2 = vector.load %arg1[%c0_1, %c0_2] : memref<16x384xbf16, #tpu.memory_space<vmem>>, vector<16x384xbf16>
    %cst = arith.constant dense<0.000000e+00> : vector<16x384xf32>
    %3 = tpu.matmul %1, %2, %cst {dimension_numbers = #tpu.dot_dimension_numbers<[1], [0], [0], [1], [0, 0, 1, 1], [], []>} : vector<16x16xbf16>, vector<16x384xbf16>, vector<16x384xf32> -> vector<16x384xf32>
    %c0_3 = arith.constant 0 : index
    %c0_4 = arith.constant 0 : index
    %4 = vector.load %arg2[%c0_3, %c0_4] : memref<1x384xf32, #tpu.memory_space<vmem>>, vector<1x384xf32>
    %5 = vector.broadcast %4 : vector<1x384xf32> to vector<16x384xf32>
    %6 = arith.addf %3, %5 : vector<16x384xf32>
    %c0_5 = arith.constant 0 : index
    %c0_6 = arith.constant 0 : index
    %7 = vector.load %arg3[%c0_5, %c0_6] : memref<16x384xf32, #tpu.memory_space<vmem>>, vector<16x384xf32>
    tpu.vector_store %arg3[%c0_5, %c0_6], %6 {strides = array<i32>} : memref<16x384xf32, #tpu.memory_space<vmem>>, vector<16x384xf32>,
    return
  }
}

</mosaic_0001>

<bundles_post_ra>
// kernel: tpu_custom_call.1
= control target key start
LH: loop header
LB: loop body
LE: loop exit
PB: predicated region body
PF: predicated region fallthrough
CT: control target
= control target key end

     0   :  { %8 = vsyncpa [#allocation3], 0  ;;  %s335_s0 = inlined_call_operand.hbm [shape: f32[16,16], index: 0, kind: input, shape index: {}]   ;;  %s336_s1 = inlined_call_operand.hbm [shape: bf16[16,384], index: 1, kind: input, shape index: {}]   ;;  %s337_s2 = inlined_call_operand.vmem [shape: f32[1,384], index: 2, kind: input, shape index: {}]   ;;  %s338_s3 = inlined_call_operand.hbm [shape: f32[16,384], index: 3, kind: output, shape index: {}]  }
   0x1   :  { %9 = vsyncpa [#allocation6], 0 }
   0x2   :  { %10 = vsyncpa [#allocation4], 0  ;;  %s291_s12 = smov [#allocation2]  }
   0x3   :  { %s16_s13 = sshll.u32 %s291_s12, 4  ;;  %s17_s13 = int_to_ptr.vmem [resolvable:$true] %s16_s13 }
   0x4   :  { %s233_s14 = scalar_lea.vmem %s17_s13, 256  ;;  %p238_p1 = scmp.lt.s32.totalorder %s17_s13, %s17_s13 }
   0x5   :  { %p234_p0 = scmp.ne.s32.totalorder %s17_s13, %s233_s14  ;;  %p239_p2 = scmp.lt.s32.totalorder %s233_s14, %s233_s14 }
   0x7   :  { %p240_p3 = por %p239_p2, %p238_p1 }
   0x9   :  { %p241_p4 = pnand %p240_p3, %p234_p0 }
   0xb   :  { %244 = shalt.err (!%p241_p4)
}
   0xc   :  { %s292_s15 = smov 128   ;;  %s293_s16 = smov 8  }
   0xd   :  { %22 = dma.hbm_to_vmem [thread:$0]  %s335_s0, 256, %s17_s13, [#allocation3], %s292_s15, %s292_s15, %s293_s16  }
   0xe   :  { %s294_s19 = smov [#allocation5]  }
   0xf   :  { %s28_s20 = sshll.u32 %s294_s19, 4  ;;  %s29_s20 = int_to_ptr.vmem [resolvable:$true] %s28_s20 }
  0x10   :  { %s253_s21 = scalar_lea.vmem %s29_s20, 384  ;;  %p258_p6 = scmp.lt.s32.totalorder %s29_s20, %s29_s20 }
  0x11   :  { %p254_p5 = scmp.ne.s32.totalorder %s29_s20, %s253_s21  ;;  %p259_p7 = scmp.lt.s32.totalorder %s253_s21, %s253_s21 }
  0x13   :  { %p260_p8 = por %p259_p7, %p258_p6 }
  0x15   :  { %p261_p9 = pnand %p260_p8, %p254_p5 }
  0x17   :  { %264 = shalt.err (!%p261_p9)
}
  0x18   :  { %s295_s22 = smov 192   ;;  %s296_s23 = smov 12  }
  0x19   :  { %34 = dma.hbm_to_vmem [thread:$0]  %s336_s1, 384, %s29_s20, [#allocation6], %s295_s22, %s295_s22, %s296_s23  }
  0x1a   :  { %285 = dma.done.wait [#allocation3], 256  }
  0x1b   :  { %286 = vsyncadd [#allocation3], 4294967040 }
  0x1c   :  { %287 = dma.done.wait [#allocation6], 384  }
  0x1d   :  { %288 = vsyncadd [#allocation6], 4294966912  ;;  %v297_v0 = vmov 0.0   ;;  %vm298_vm0 = vmmov 0   ;;  %v299_v1 = vmov 0   ;;  %v44_v5 = vld [vmem:[#allocation2] sm:$0xff]  ;;  %v53_v8 = vlaneseq }
  0x1e   :  { %203 = vmatprep.subr.bf16.mxu1 %v297_v0  ;;  %205 = vmatprep.mubr.msk.bf16.mxu1 %vm298_vm0, %v297_v0  ;;  %v221_v2 = vld [vmem:[#allocation5 + $0x4] ss:$12 sps:$4 sm:$0xff]   ;;  %v223_v3 = vld [vmem:[#allocation5 + $0x8] ss:$12 sps:$4 sm:$0xff]   ;;  %v224_v4 = vld [vmem:[#allocation5] ss:$12 sps:$4 sm:$0xff]  }
  0x1f   :  { %120 = vmatprep.mubr.bf16.mxu0 %v299_v1  ;;  %102 = vmatprep.subr.bf16.mxu0 %v221_v2  ;;  %v45_v6 = vld [vmem:[#allocation2 + $0x8] sm:$0xff]  ;;  %vm84_vm1 = vcmask 130048   ;;  %v54_v9 = vshrl.u32 %v53_v8, 7  ;;  %v51_v12 = vld [vmem:[%s337_s2] sm:$0x7]  ;;  %s300_s26 = smov [#allocation7]  }
  0x20   :  { %204 = vmatpush3.bf16.msra.mxu1 %v223_v3  ;;  %v46_v7 = vpack.c.bf16 %v45_v6, %v44_v5  ;;  %103 = vmatpush1.bf16.msra.mxu0 %v224_v4  ;;  %s183_s27 = sshll.u32 %s300_s26, 4  ;;  %s184_s27 = int_to_ptr.vmem [resolvable:$true] %s183_s27 }
  0x21   :  { %v63_v10 = vsub.s32 2, %v54_v9  ;;  %v55_v11 = vsub.s32 0, %v54_v9  ;;  %v59_v13 = vsub.s32 1, %v54_v9  ;;  %s265_s2 = scalar_lea.vmem %s184_s27, 768  ;;  %p270_p11 = scmp.lt.s32.totalorder %s184_s27, %s184_s27 }
  0x22   :  { %p266_p10 = scmp.ne.s32.totalorder %s184_s27, %s265_s2  ;;  %p271_p12 = scmp.lt.s32.totalorder %s265_s2, %s265_s2 }
  0x23   :  { %206 = vmatmul.mubr.msk.bf16.vlgmr.msra.gmra.mxu1 %vm84_vm1, %v46_v7  ;;  %199 = vmatmul.mubr.msk.bf16.vlgmr.msra.gmra.mxu0 %vm84_vm1, %v46_v7  ;;  %v64_v14 = vrot.slane %v51_v12, %v63_v10  ;;  %v56_v15 = vrot.slane %v51_v12, %v55_v11  ;;  %v60_v17 = vrot.slane %v51_v12, %v59_v13 }
  0x24   :  { %p272_p13 = por %p271_p12, %p270_p11 }
  0x26   :  { %p273_p0 = pnand %p272_p13, %p266_p10 }
  0xe3   :  { %v165_v16 = vpop.f32.mrf.mxu1  ;;  %v122_v19 = vpop.f32.mrf.mxu0 }
  0xe4   :  { %v166_v18 = vadd.f32 %v165_v16, %v64_v14  ;;  %v123_v20 = vadd.f32 %v122_v19, %v56_v15 }
  0xe5   :  { %v207_v21 = vpop.f32.mrf.mxu1  ;;  %v124_v22 = vpop.f32.mrf.mxu0 }
  0xe6   :  { %174 = vst [vmem:[#allocation7 + $0x10] sm:$0xff] %v166_v18  ;;  %172 = vst [vmem:[#allocation7] sm:$0xff] %v123_v20  ;;  %v125_v23 = vadd.f32 %v124_v22, %v60_v17 }
  0xe7   :  { %v168_v24 = vpop.f32.mrf.mxu1  ;;  %v126_v26 = vpop.f32.mrf.mxu0 }
  0xe8   :  { %v169_v25 = vadd.f32 %v168_v24, %v64_v14  ;;  %173 = vst [vmem:[#allocation7 + $0x8] sm:$0xff] %v125_v23  ;;  %v127_v27 = vadd.f32 %v126_v26, %v56_v15 }
  0xe9   :  { %v208_v28 = vpop.f32.mrf.mxu1  ;;  %v128_v29 = vpop.f32.mrf.mxu0 }
  0xea   :  { %177 = vst [vmem:[#allocation7 + $0x28] sm:$0xff] %v169_v25  ;;  %175 = vst [vmem:[#allocation7 + $0x18] sm:$0xff] %v127_v27  ;;  %v129_v30 = vadd.f32 %v128_v29, %v60_v17 }
  0xec   :  { %176 = vst [vmem:[#allocation7 + $0x20] sm:$0xff] %v129_v30 }
  0xed   :  { %276 = shalt.err (!%p273_p0)
}
  0xee   :  { %s301_s28 = smov 384   ;;  %s302_s29 = smov 24  }
  0xef   :  { %189 = dma.vmem_to_hbm [thread:$0]  %s184_s27, 768, %s338_s3, [#allocation4], %s301_s28, %s301_s28, %s302_s29  }
  0xf0   :  { %289 = dma.done.wait [#allocation4], 768  }
  0xf1   :  { %290 = vsyncadd [#allocation4], 4294966528 }
  0xf2   :  { %193 = vsyncpa [#allocation3], 1 }
  0xf3   :  { %194 = vsyncpa [#allocation6], 1 }
  0xf4   :  { %195 = vsyncpa [#allocation4], 1 }

</bundles_post_ra>
